<compile_context>
chip_gen: v7x
topology: tpu7x:2x2x1
jax: 0.10.0
libtpu: 0.0.40
codegen_flags: <defaults>
</compile_context>

<pallas_src>
import jax
import jax.numpy as jnp
from jax import lax
from jax.experimental import pallas as pl
from jax.experimental.pallas import tpu as pltpu


# ----------------------------------------------------------------------------- kernel
def _make_kernel(n_keys, tk, nkt):
    """Build the attention kernel for static (n_keys, key-tile, num key tiles)."""
    needs_mask = (nkt * tk != n_keys)   # ragged / padded key tiles

    def kernel(q_ref, k_ref, v_ref, w_ref, out_ref, wts_ref,
               e_sc, m_sc, l_sc, acc_sc):
        ki = pl.program_id(1)
        last = pl.num_programs(1) - 1

        # ---- init running softmax state at the first key tile -------------
        @pl.when(ki == 0)
        def _():
            m_sc[...] = jnp.full(m_sc.shape, -jnp.inf, dtype=jnp.float32)
            l_sc[...] = jnp.zeros(l_sc.shape, dtype=jnp.float32)
            acc_sc[...] = jnp.zeros(acc_sc.shape, dtype=jnp.float32)

        # ---- reassociated projection: project the query, not the keys -----
        #   energies_bn = Q_b . (W K_bn + bias) == (Q_b W) . K_bn + const_b
        #   (bias term is constant over n -> cancels exactly in softmax)
        qp = jnp.dot(q_ref[...].astype(jnp.float32),
                     w_ref[...].astype(jnp.float32),
                     preferred_element_type=jnp.float32)            # [TB, dim_k]

        k = k_ref[...].astype(jnp.float32)                          # [TB, TK, dim_k]
        v = v_ref[...].astype(jnp.float32)                          # [TB, TK, dim_v]

        # energies for this key tile: VPU broadcast-mul + cross-lane reduce
        e = jnp.sum(k * qp[:, None, :], axis=-1)                    # [TB, TK]

        if needs_mask:
            col = lax.broadcasted_iota(jnp.int32, e.shape, 1) + ki * tk
            e = jnp.where(col < n_keys, e, -jnp.inf)

        # keep raw energies resident for the exact final weights store
        if nkt == 1:
            e_sc[...] = e
        else:
            start = pl.multiple_of(ki * tk, 128)   # tk is a multiple of 128 when split
            e_sc[:, pl.ds(start, tk)] = e

        # ---- online softmax accumulation over key tiles --------------------
        m_old = m_sc[...]                                           # [TB, 1]
        m_new = jnp.maximum(m_old, jnp.max(e, axis=-1, keepdims=True))
        alpha = jnp.exp(m_old - m_new)
        p = jnp.exp(e - m_new)                                      # [TB, TK]
        l_sc[...] = alpha * l_sc[...] + jnp.sum(p, axis=-1, keepdims=True)
        acc_sc[...] = alpha * acc_sc[...] + jnp.sum(p[:, :, None] * v, axis=1)
        m_sc[...] = m_new

        # ---- finalize: normalize and store lane-dense slabs -----------------
        @pl.when(ki == last)
        def _():
            inv_l = 1.0 / l_sc[...]       # exact division: kernel is mem-bound
            out_ref[...] = (acc_sc[...] * inv_l).astype(out_ref.dtype)
            wts_ref[...] = (jnp.exp(e_sc[:, :n_keys] - m_sc[...]) * inv_l
                            ).astype(wts_ref.dtype)

    return kernel


# ----------------------------------------------------------------------------- sizing
def _vmem_capacity_bytes():
    try:
        cap = int(pltpu.get_tpu_info().vmem_capacity_bytes)
        if cap > 0:
            return cap
    except Exception:
        pass
    return 64 << 20   # v7x per-TC VMEM: safe lower bound across generations


def _footprint_bytes(tb, tk, nkt, n_keys, dim_q, dim_k, dim_v, itemsize):
    """Estimated per-step VMEM: double-buffered I/O tiles + scratch + f32 temps."""
    fp32 = 4
    kv = tb * tk * (dim_k + dim_v)
    dbl = 2 * itemsize * (kv + tb * dim_q + dim_q * dim_k
                          + tb * dim_v + tb * n_keys)
    scratch = fp32 * tb * (nkt * tk + 2 + dim_v)          # e_sc + m/l + acc
    interm = fp32 * kv                                    # broadcast products
    return dbl + scratch + interm


def _choose_tiles(B, n_keys, dim_q, dim_k, dim_v, itemsize, budget):
    """Pick (TB, TK, NKT): biggest batch slab that fits; split n_keys only if forced."""
    def fits(tb, tk, nkt):
        return _footprint_bytes(tb, tk, nkt, n_keys,
                                dim_q, dim_k, dim_v, itemsize) <= budget

    def round8(x):
        return x if x >= B else max(8, (x // 8) * 8)

    # Preferred: no key split, shrink the batch tile until it fits.
    tb = round8(min(B, 512))
    while tb > 8 and tb != B and not fits(tb, n_keys, 1):
        tb = round8(tb // 2)
    if fits(tb, n_keys, 1):
        return tb, n_keys, 1

    # Forced key split (huge n_keys*(dim_k+dim_v), e.g. v7x 64 MiB VMEM).
    # TK multiple of 128 -> lane-aligned dynamic stores into the energy scratch.
    tb = 8 if B > 8 else B
    tk = max(128, ((n_keys // 2) // 128) * 128)
    while tk > 128 and not fits(tb, tk, pl.cdiv(n_keys, tk)):
        tk = max(128, ((tk // 2) // 128) * 128)
    return tb, tk, pl.cdiv(n_keys, tk)


# ----------------------------------------------------------------------------- wrapper
def general_attention(Q, K, V, W, bias=None):
    """Q: [B, dim_q], K: [B, n_keys, dim_k], V: [B, n_keys, dim_v],
    W: [dim_q, dim_k] (nn.Linear layout), bias: [dim_q] (unused: its energy
    contribution is constant over keys and cancels exactly in softmax).
    Returns (output [B, dim_v], weights [B, n_keys])."""
    del bias   # exactly cancels in softmax; (output, weights) unchanged

    B, dim_q = Q.shape
    _, n_keys, dim_k = K.shape
    dim_v = V.shape[-1]
    itemsize = jnp.dtype(Q.dtype).itemsize

    capacity = _vmem_capacity_bytes()
    budget = min(int(0.40 * capacity), 48 << 20)
    TB, TK, NKT = _choose_tiles(B, n_keys, dim_q, dim_k, dim_v, itemsize, budget)
    est = _footprint_bytes(TB, TK, NKT, n_keys, dim_q, dim_k, dim_v, itemsize)
    vmem_limit = int(min(capacity, max(32 << 20, est + (8 << 20))))

    grid = (pl.cdiv(B, TB), NKT)
    kernel = _make_kernel(n_keys, TK, NKT)

    out_shapes = (
        jax.ShapeDtypeStruct((B, dim_v), Q.dtype),
        jax.ShapeDtypeStruct((B, n_keys), Q.dtype),
    )

    # Advisory cost: tiny projection + K/V streaming multiply-reduce.
    flops = 2 * B * dim_q * dim_k * NKT + 2 * B * n_keys * (dim_k + dim_v)
    transcendentals = 2 * B * n_keys
    bytes_accessed = itemsize * (int(Q.size) + int(K.size) + int(V.size)
                                 + int(W.size) + B * dim_v + B * n_keys)

    grid_spec = pltpu.PrefetchScalarGridSpec(
        num_scalar_prefetch=0,
        grid=grid,
        in_specs=[
            pl.BlockSpec((TB, dim_q), lambda bi, ki: (bi, 0)),            # Q tile
            pl.BlockSpec((TB, TK, dim_k), lambda bi, ki: (bi, ki, 0)),    # K tile
            pl.BlockSpec((TB, TK, dim_v), lambda bi, ki: (bi, ki, 0)),    # V tile
            pl.BlockSpec((dim_q, dim_k), lambda bi, ki: (0, 0)),          # W (invariant)
        ],
        out_specs=[
            pl.BlockSpec((TB, dim_v), lambda bi, ki: (bi, 0)),            # output slab
            pl.BlockSpec((TB, n_keys), lambda bi, ki: (bi, 0)),           # weights slab
        ],
        scratch_shapes=[
            pltpu.VMEM((TB, NKT * TK), jnp.float32),   # resident raw energies
            pltpu.VMEM((TB, 1), jnp.float32),          # running max
            pltpu.VMEM((TB, 1), jnp.float32),          # running denom
            pltpu.VMEM((TB, dim_v), jnp.float32),      # output accumulator
        ],
    )

    return pl.pallas_call(
        kernel,
        out_shape=out_shapes,
        grid_spec=grid_spec,
        cost_estimate=pl.CostEstimate(flops=int(flops),
                                      transcendentals=int(transcendentals),
                                      bytes_accessed=int(bytes_accessed)),
        compiler_params=pltpu.CompilerParams(
            dimension_semantics=("parallel", "arbitrary"),
            vmem_limit_bytes=vmem_limit),
    )(Q, K, V, W)


# ----------------------------------------------------------------------------- reference
def _reference(Q, K, V, W, bias):
    keys = jnp.einsum("bnk,qk->bnq", K, W) + bias          # [B, n_keys, dim_q]
    energies = jnp.einsum("bq,bnq->bn", Q, keys)           # [B, n_keys]
    weights = jax.nn.softmax(energies, axis=-1)
    output = jnp.einsum("bn,bnv->bv", weights, V)
    return output, weights


if __name__ == "__main__":
    # Small shapes consistent with the module's forward.
    B, n_keys, dim_q, dim_k, dim_v = 2, 8, 16, 32, 32

    key = jax.random.PRNGKey(0)
    kq, kk, kv, kw, kb = jax.random.split(key, 5)

    Q = jax.random.normal(kq, (B, dim_q), dtype=jnp.float32)
    K = jax.random.normal(kk, (B, n_keys, dim_k), dtype=jnp.float32)
    V = jax.random.normal(kv, (B, n_keys, dim_v), dtype=jnp.float32)

    # nn.Linear(dim_k, dim_q): W [dim_q, dim_k], b [dim_q].
    bound = 1.0 / (dim_k ** 0.5)
    W = jax.random.uniform(kw, (dim_q, dim_k), minval=-bound, maxval=bound,
                           dtype=jnp.float32)
    bias = jax.random.uniform(kb, (dim_q,), minval=-bound, maxval=bound,
                              dtype=jnp.float32)

    out, wts = general_attention(Q, K, V, W, bias)
    out, wts = jax.block_until_ready((out, wts))

    ref_out, ref_wts = _reference(Q, K, V, W, bias)
    assert jnp.allclose(out, ref_out, atol=1e-4, rtol=1e-4), "output mismatch"
    assert jnp.allclose(wts, ref_wts, atol=1e-4, rtol=1e-4), "weights mismatch"

    print("KERNEL_OK")
</pallas_src>

<mosaic_0001>
module attributes {stable_mosaic.version = 11 : i64} {
  func.func @kernel(%arg0: i32, %arg1: i32, %arg2: memref<2x16xf32, #tpu.memory_space<vmem>>, %arg3: memref<2x8x32xf32, #tpu.memory_space<vmem>>, %arg4: memref<2x8x32xf32, #tpu.memory_space<vmem>>, %arg5: memref<16x32xf32, #tpu.memory_space<vmem>>, %arg6: memref<2x32xf32, #tpu.memory_space<vmem>>, %arg7: memref<2x8xf32, #tpu.memory_space<vmem>>, %arg8: memref<2x8xf32, #tpu.memory_space<vmem>>, %arg9: memref<2x1xf32, #tpu.memory_space<vmem>>, %arg10: memref<2x1xf32, #tpu.memory_space<vmem>>, %arg11: memref<2x32xf32, #tpu.memory_space<vmem>>) attributes {dimension_semantics = [#tpu.dimension_semantics<parallel>, #tpu.dimension_semantics<arbitrary>], iteration_bounds = array<i64: 1, 1>, scalar_prefetch = 0 : i64, scratch_operands = 4 : i64, tpu.core_type = #tpu.core_type<tc>, window_params = [{transform_indices = @transform_0, window_bounds = array<i64: 2, 16>}, {transform_indices = @transform_1, window_bounds = array<i64: 2, 8, 32>}, {transform_indices = @transform_2, window_bounds = array<i64: 2, 8, 32>}, {pipeline_mode = #tpu.pipeline_mode<synchronous>, transform_indices = @transform_3, window_bounds = array<i64: 16, 32>}, {transform_indices = @transform_4, window_bounds = array<i64: 2, 32>}, {transform_indices = @transform_5, window_bounds = array<i64: 2, 8>}]} {
    %c0_i32 = arith.constant 0 : i32
    %0 = arith.cmpi eq, %arg1, %c0_i32 : i32
    %1 = arith.extui %0 : i1 to i32
    %c0_i32_0 = arith.constant 0 : i32
    %2 = arith.cmpi ne, %1, %c0_i32_0 : i32
    scf.if %2 {
      %cst_30 = arith.constant 0xFF800000 : f32
      %41 = vector.broadcast %cst_30 : f32 to vector<2x1xf32>
      %c0_31 = arith.constant 0 : index
      %c0_32 = arith.constant 0 : index
      %42 = vector.load %arg9[%c0_31, %c0_32] : memref<2x1xf32, #tpu.memory_space<vmem>>, vector<2x1xf32>
      tpu.vector_store %arg9[%c0_31, %c0_32], %41 {strides = array<i32>} : memref<2x1xf32, #tpu.memory_space<vmem>>, vector<2x1xf32>,
      %cst_33 = arith.constant 0.000000e+00 : f32
      %43 = vector.broadcast %cst_33 : f32 to vector<2x1xf32>
      %c0_34 = arith.constant 0 : index
      %c0_35 = arith.constant 0 : index
      %44 = vector.load %arg10[%c0_34, %c0_35] : memref<2x1xf32, #tpu.memory_space<vmem>>, vector<2x1xf32>
      tpu.vector_store %arg10[%c0_34, %c0_35], %43 {strides = array<i32>} : memref<2x1xf32, #tpu.memory_space<vmem>>, vector<2x1xf32>,
      %cst_36 = arith.constant 0.000000e+00 : f32
      %45 = vector.broadcast %cst_36 : f32 to vector<2x32xf32>
      %c0_37 = arith.constant 0 : index
      %c0_38 = arith.constant 0 : index
      %46 = vector.load %arg11[%c0_37, %c0_38] : memref<2x32xf32, #tpu.memory_space<vmem>>, vector<2x32xf32>
      tpu.vector_store %arg11[%c0_37, %c0_38], %45 {strides = array<i32>} : memref<2x32xf32, #tpu.memory_space<vmem>>, vector<2x32xf32>,
    } else {
    }
    %c0 = arith.constant 0 : index
    %c0_1 = arith.constant 0 : index
    %3 = vector.load %arg2[%c0, %c0_1] : memref<2x16xf32, #tpu.memory_space<vmem>>, vector<2x16xf32>
    %c0_2 = arith.constant 0 : index
    %c0_3 = arith.constant 0 : index
    %4 = vector.load %arg5[%c0_2, %c0_3] : memref<16x32xf32, #tpu.memory_space<vmem>>, vector<16x32xf32>
    %cst = arith.constant dense<0.000000e+00> : vector<2x32xf32>
    %5 = tpu.matmul %3, %4, %cst {dimension_numbers = #tpu.dot_dimension_numbers<[1], [0], [0], [1], [0, 0, 1, 1], [], []>} : vector<2x16xf32>, vector<16x32xf32>, vector<2x32xf32> -> vector<2x32xf32>
    %c0_4 = arith.constant 0 : index
    %c0_5 = arith.constant 0 : index
    %c0_6 = arith.constant 0 : index
    %6 = vector.load %arg3[%c0_4, %c0_5, %c0_6] : memref<2x8x32xf32, #tpu.memory_space<vmem>>, vector<2x8x32xf32>
    %c0_7 = arith.constant 0 : index
    %c0_8 = arith.constant 0 : index
    %c0_9 = arith.constant 0 : index
    %7 = vector.load %arg4[%c0_7, %c0_8, %c0_9] : memref<2x8x32xf32, #tpu.memory_space<vmem>>, vector<2x8x32xf32>
    %8 = vector.shape_cast %5 : vector<2x32xf32> to vector<2x1x32xf32>
    %9 = vector.broadcast %8 : vector<2x1x32xf32> to vector<2x8x32xf32>
    %10 = arith.mulf %6, %9 : vector<2x8x32xf32>
    %cst_10 = arith.constant dense<0.000000e+00> : vector<2x8xf32>
    %11 = vector.multi_reduction <add>, %10, %cst_10 [2] : vector<2x8x32xf32> to vector<2x8xf32>
    %c0_11 = arith.constant 0 : index
    %c0_12 = arith.constant 0 : index
    %12 = vector.load %arg8[%c0_11, %c0_12] : memref<2x8xf32, #tpu.memory_space<vmem>>, vector<2x8xf32>
    tpu.vector_store %arg8[%c0_11, %c0_12], %11 {strides = array<i32>} : memref<2x8xf32, #tpu.memory_space<vmem>>, vector<2x8xf32>,
    %c0_13 = arith.constant 0 : index
    %c0_14 = arith.constant 0 : index
    %13 = vector.load %arg9[%c0_13, %c0_14] : memref<2x1xf32, #tpu.memory_space<vmem>>, vector<2x1xf32>
    %cst_15 = arith.constant dense<0xFF800000> : vector<2xf32>
    %14 = vector.multi_reduction <maximumf>, %11, %cst_15 [1] : vector<2x8xf32> to vector<2xf32>
    %15 = vector.shape_cast %14 : vector<2xf32> to vector<2x1xf32>
    %16 = arith.maximumf %13, %15 : vector<2x1xf32>
    %17 = arith.subf %13, %16 : vector<2x1xf32>
    %18 = math.exp %17 : vector<2x1xf32>
    %19 = vector.broadcast %16 : vector<2x1xf32> to vector<2x8xf32>
    %20 = arith.subf %11, %19 : vector<2x8xf32>
    %21 = math.exp %20 : vector<2x8xf32>
    %c0_16 = arith.constant 0 : index
    %c0_17 = arith.constant 0 : index
    %22 = vector.load %arg10[%c0_16, %c0_17] : memref<2x1xf32, #tpu.memory_space<vmem>>, vector<2x1xf32>
    %23 = arith.mulf %18, %22 : vector<2x1xf32>
    %cst_18 = arith.constant dense<0.000000e+00> : vector<2xf32>
    %24 = vector.multi_reduction <add>, %21, %cst_18 [1] : vector<2x8xf32> to vector<2xf32>
    %25 = vector.shape_cast %24 : vector<2xf32> to vector<2x1xf32>
    %26 = arith.addf %23, %25 : vector<2x1xf32>
    %c0_19 = arith.constant 0 : index
    %c0_20 = arith.constant 0 : index
    %27 = vector.load %arg10[%c0_19, %c0_20] : memref<2x1xf32, #tpu.memory_space<vmem>>, vector<2x1xf32>
    tpu.vector_store %arg10[%c0_19, %c0_20], %26 {strides = array<i32>} : memref<2x1xf32, #tpu.memory_space<vmem>>, vector<2x1xf32>,
    %c0_21 = arith.constant 0 : index
    %c0_22 = arith.constant 0 : index
    %28 = vector.load %arg11[%c0_21, %c0_22] : memref<2x32xf32, #tpu.memory_space<vmem>>, vector<2x32xf32>
    %29 = vector.broadcast %18 : vector<2x1xf32> to vector<2x32xf32>
    %30 = arith.mulf %29, %28 : vector<2x32xf32>
    %31 = vector.shape_cast %21 : vector<2x8xf32> to vector<2x8x1xf32>
    %32 = vector.broadcast %31 : vector<2x8x1xf32> to vector<2x8x32xf32>
    %33 = arith.mulf %32, %7 : vector<2x8x32xf32>
    %cst_23 = arith.constant dense<0.000000e+00> : vector<2x32xf32>
    %34 = vector.multi_reduction <add>, %33, %cst_23 [1] : vector<2x8x32xf32> to vector<2x32xf32>
    %35 = arith.addf %30, %34 : vector<2x32xf32>
    %c0_24 = arith.constant 0 : index
    %c0_25 = arith.constant 0 : index
    %36 = vector.load %arg11[%c0_24, %c0_25] : memref<2x32xf32, #tpu.memory_space<vmem>>, vector<2x32xf32>
    tpu.vector_store %arg11[%c0_24, %c0_25], %35 {strides = array<i32>} : memref<2x32xf32, #tpu.memory_space<vmem>>, vector<2x32xf32>,
    %c0_26 = arith.constant 0 : index
    %c0_27 = arith.constant 0 : index
    %37 = vector.load %arg9[%c0_26, %c0_27] : memref<2x1xf32, #tpu.memory_space<vmem>>, vector<2x1xf32>
    tpu.vector_store %arg9[%c0_26, %c0_27], %16 {strides = array<i32>} : memref<2x1xf32, #tpu.memory_space<vmem>>, vector<2x1xf32>,
    %c0_i32_28 = arith.constant 0 : i32
    %38 = arith.cmpi eq, %arg1, %c0_i32_28 : i32
    %39 = arith.extui %38 : i1 to i32
    %c0_i32_29 = arith.constant 0 : i32
    %40 = arith.cmpi ne, %39, %c0_i32_29 : i32
    scf.if %40 {
      %c0_30 = arith.constant 0 : index
      %c0_31 = arith.constant 0 : index
      %41 = vector.load %arg10[%c0_30, %c0_31] : memref<2x1xf32, #tpu.memory_space<vmem>>, vector<2x1xf32>
      %cst_32 = arith.constant 1.000000e+00 : f32
      %42 = vector.broadcast %cst_32 : f32 to vector<2x1xf32>
      %43 = arith.divf %42, %41 : vector<2x1xf32>
      %c0_33 = arith.constant 0 : index
      %c0_34 = arith.constant 0 : index
      %44 = vector.load %arg11[%c0_33, %c0_34] : memref<2x32xf32, #tpu.memory_space<vmem>>, vector<2x32xf32>
      %45 = vector.broadcast %43 : vector<2x1xf32> to vector<2x32xf32>
      %46 = arith.mulf %44, %45 : vector<2x32xf32>
      %c0_35 = arith.constant 0 : index
      %c0_36 = arith.constant 0 : index
      %47 = vector.load %arg6[%c0_35, %c0_36] : memref<2x32xf32, #tpu.memory_space<vmem>>, vector<2x32xf32>
      tpu.vector_store %arg6[%c0_35, %c0_36], %46 {strides = array<i32>} : memref<2x32xf32, #tpu.memory_space<vmem>>, vector<2x32xf32>,
      %c0_37 = arith.constant 0 : index
      %c0_38 = arith.constant 0 : index
      %48 = vector.load %arg8[%c0_37, %c0_38] : memref<2x8xf32, #tpu.memory_space<vmem>>, vector<2x8xf32>
      %c0_39 = arith.constant 0 : index
      %c0_40 = arith.constant 0 : index
      %49 = vector.load %arg9[%c0_39, %c0_40] : memref<2x1xf32, #tpu.memory_space<vmem>>, vector<2x1xf32>
      %50 = vector.broadcast %49 : vector<2x1xf32> to vector<2x8xf32>
      %51 = arith.subf %48, %50 : vector<2x8xf32>
      %52 = math.exp %51 : vector<2x8xf32>
      %53 = vector.broadcast %43 : vector<2x1xf32> to vector<2x8xf32>
      %54 = arith.mulf %52, %53 : vector<2x8xf32>
      %c0_41 = arith.constant 0 : index
      %c0_42 = arith.constant 0 : index
      %55 = vector.load %arg7[%c0_41, %c0_42] : memref<2x8xf32, #tpu.memory_space<vmem>>, vector<2x8xf32>
      tpu.vector_store %arg7[%c0_41, %c0_42], %54 {strides = array<i32>} : memref<2x8xf32, #tpu.memory_space<vmem>>, vector<2x8xf32>,
    } else {
    }
    return
  }
  func.func @transform_0(%arg0: i32, %arg1: i32) -> (i32, i32) {
    %c0_i32 = arith.constant 0 : i32
    %c0_i32_0 = arith.constant 0 : i32
    return %arg0, %c0_i32 : i32, i32
  }
  func.func @transform_1(%arg0: i32, %arg1: i32) -> (i32, i32, i32) {
    %c0_i32 = arith.constant 0 : i32
    %c0_i32_0 = arith.constant 0 : i32
    return %arg0, %arg1, %c0_i32 : i32, i32, i32
  }
  func.func @transform_2(%arg0: i32, %arg1: i32) -> (i32, i32, i32) {
    %c0_i32 = arith.constant 0 : i32
    %c0_i32_0 = arith.constant 0 : i32
    return %arg0, %arg1, %c0_i32 : i32, i32, i32
  }
  func.func @transform_3(%arg0: i32, %arg1: i32) -> (i32, i32) {
    %c0_i32 = arith.constant 0 : i32
    %c0_i32_0 = arith.constant 0 : i32
    %c0_i32_1 = arith.constant 0 : i32
    return %c0_i32, %c0_i32_0 : i32, i32
  }
  func.func @transform_4(%arg0: i32, %arg1: i32) -> (i32, i32) {
    %c0_i32 = arith.constant 0 : i32
    %c0_i32_0 = arith.constant 0 : i32
    return %arg0, %c0_i32 : i32, i32
  }
  func.func @transform_5(%arg0: i32, %arg1: i32) -> (i32, i32) {
    %c0_i32 = arith.constant 0 : i32
    %c0_i32_0 = arith.constant 0 : i32
    return %arg0, %c0_i32 : i32, i32
  }
}

</mosaic_0001>

<bundles_post_ra>
// kernel: tpu_custom_call.1
= control target key start
LH: loop header
LB: loop body
LE: loop exit
PB: predicated region body
PF: predicated region fallthrough
CT: control target
= control target key end

     0   :  { %11 = vsyncpa [#allocation7], 0  ;;  %s692_s0 = inlined_call_operand.hbm [shape: f32[2,16], index: 0, kind: input, shape index: {}]   ;;  %s693_s1 = inlined_call_operand.hbm [shape: f32[2,8,32], index: 1, kind: input, shape index: {}]   ;;  %s694_s2 = inlined_call_operand.hbm [shape: f32[2,8,32], index: 2, kind: input, shape index: {}]   ;;  %s695_s3 = inlined_call_operand.hbm [shape: f32[16,32], index: 3, kind: input, shape index: {}]   ;;  %s696_s4 = inlined_call_operand.hbm [shape: f32[2,32], index: 4, kind: output, shape index: {0}]   ;;  %s697_s5 = inlined_call_operand.hbm [shape: f32[2,8], index: 5, kind: output, shape index: {1}]  }
   0x1   :  { %12 = vsyncpa [#allocation10], 0 }
   0x2   :  { %13 = vsyncpa [#allocation13], 0 }
   0x3   :  { %14 = vsyncpa [#allocation8], 0 }
   0x4   :  { %15 = vsyncpa [#allocation16], 0  ;;  %s549_s18 = smov [#allocation9]   ;;  %s407_s22 = scalar_lea.hbm %s693_s1, 256 }
   0x5   :  { %s31_s19 = sshll.u32 %s549_s18, 4  ;;  %p408_p0 = scmp.ne.s32.totalorder %s693_s1, %s407_s22  ;;  %s32_s19 = int_to_ptr.vmem [resolvable:$true] %s31_s19 }
   0x6   :  { %p411_p1 = scmp.lt.u32.totalorder %s407_s22, %s693_s1 }
   0x8   :  { %p413_p2 = pnand %p411_p1, %p408_p0 }
   0xa   :  { %416 = shalt.err (!%p413_p2)
}
   0xb   :  { %s417_s27 = scalar_lea.vmem %s32_s19, 256  ;;  %p422_p4 = scmp.lt.s32.totalorder %s32_s19, %s32_s19 }
   0xc   :  { %p418_p3 = scmp.ne.s32.totalorder %s32_s19, %s417_s27  ;;  %p423_p5 = scmp.lt.s32.totalorder %s417_s27, %s417_s27 }
   0xe   :  { %p424_p6 = por %p423_p5, %p422_p4 }
  0x10   :  { %p425_p7 = pnand %p424_p6, %p418_p3 }
  0x12   :  { %428 = shalt.err (!%p425_p7)
}
  0x13   :  { %s550_s28 = smov 128   ;;  %s551_s29 = smov 8  }
  0x14   :  { %37 = dma.hbm_to_vmem [thread:$0]  %s693_s1, 256, %s32_s19, [#allocation10], %s550_s28, %s550_s28, %s551_s29  }
  0x15   :  { %s552_s7 = smov [#allocation6]   ;;  %s553_s9 = smov [#allocation11]  }
  0x16   :  { %s22_s8 = sshll.u32 %s552_s7, 4  ;;  %s43_s10 = sshll.u32 %s553_s9, 4  ;;  %s23_s8 = int_to_ptr.vmem [resolvable:$true] %s22_s8  ;;  %s44_s10 = int_to_ptr.vmem [resolvable:$true] %s43_s10 }
  0x17   :  { %s429_s13 = scalar_lea.hbm %s692_s0, 32 }
  0x18   :  { %p430_p8 = scmp.ne.s32.totalorder %s692_s0, %s429_s13  ;;  %p433_p9 = scmp.lt.u32.totalorder %s429_s13, %s692_s0 }
  0x1a   :  { %p435_p10 = pnand %p433_p9, %p430_p8 }
  0x1c   :  { %438 = shalt.err (!%p435_p10)
}
  0x1d   :  { %s439_s1 = scalar_lea.vmem %s23_s8, 32  ;;  %p444_p12 = scmp.lt.s32.totalorder %s23_s8, %s23_s8 }
  0x1e   :  { %p440_p11 = scmp.ne.s32.totalorder %s23_s8, %s439_s1  ;;  %p445_p13 = scmp.lt.s32.totalorder %s439_s1, %s439_s1 }
  0x20   :  { %p446_p0 = por %p445_p13, %p444_p12 }
  0x22   :  { %p447_p1 = pnand %p446_p0, %p440_p11 }
  0x24   :  { %450 = shalt.err (!%p447_p1)
}
  0x25   :  { %25 = dma.hbm_to_vmem [thread:$0]  %s692_s0, 32, %s23_s8, [#allocation7]  }
  0x26   :  { %s451_s22 = scalar_lea.hbm %s694_s2, 256 }
  0x27   :  { %p452_p2 = scmp.ne.s32.totalorder %s694_s2, %s451_s22  ;;  %p455_p3 = scmp.lt.u32.totalorder %s451_s22, %s694_s2 }
  0x29   :  { %p457_p4 = pnand %p455_p3, %p452_p2 }
  0x2b   :  { %460 = shalt.err (!%p457_p4)
}
  0x2c   :  { %s461_s27 = scalar_lea.vmem %s44_s10, 256  ;;  %p466_p6 = scmp.lt.s32.totalorder %s44_s10, %s44_s10 }
  0x2d   :  { %p462_p5 = scmp.ne.s32.totalorder %s44_s10, %s461_s27  ;;  %p467_p7 = scmp.lt.s32.totalorder %s461_s27, %s461_s27 }
  0x2f   :  { %p468_p8 = por %p467_p7, %p466_p6 }
  0x31   :  { %p469_p9 = pnand %p468_p8, %p462_p5 }
  0x33   :  { %472 = shalt.err (!%p469_p9)
}
  0x34   :  { %49 = dma.hbm_to_vmem [thread:$0]  %s694_s2, 256, %s44_s10, [#allocation10], %s550_s28, %s550_s28, %s551_s29  }
  0x35   :  { %s554_s6 = smov [#allocation12]   ;;  %s473_s11 = scalar_lea.hbm %s695_s3, 256 }
  0x36   :  { %s55_s7 = sshll.u32 %s554_s6, 4  ;;  %p474_p10 = scmp.ne.s32.totalorder %s695_s3, %s473_s11  ;;  %s56_s7 = int_to_ptr.vmem [resolvable:$true] %s55_s7 }
  0x37   :  { %p477_p11 = scmp.lt.u32.totalorder %s473_s11, %s695_s3 }
  0x39   :  { %p479_p12 = pnand %p477_p11, %p474_p10 }
  0x3b   :  { %482 = shalt.err (!%p479_p12)
}
  0x3c   :  { %s483_s16 = scalar_lea.vmem %s56_s7, 256  ;;  %p488_p0 = scmp.lt.s32.totalorder %s56_s7, %s56_s7 }
  0x3d   :  { %p484_p13 = scmp.ne.s32.totalorder %s56_s7, %s483_s16  ;;  %p489_p1 = scmp.lt.s32.totalorder %s483_s16, %s483_s16 }
  0x3f   :  { %p490_p2 = por %p489_p1, %p488_p0 }
  0x41   :  { %p491_p3 = pnand %p490_p2, %p484_p13 }
  0x43   :  { %494 = shalt.err (!%p491_p3)
}
  0x44   :  { %61 = dma.hbm_to_vmem [thread:$0]  %s695_s3, 256, %s56_s7, [#allocation13], %s550_s28, %s550_s28, %s551_s29  }
  0x45   :  { %539 = dma.done.wait [#allocation7], 32  }
  0x46   :  { %540 = vsyncadd [#allocation7], 4294967264 }
  0x47   :  { %541 = dma.done.wait [#allocation10], 512  }
  0x48   :  { %542 = vsyncadd [#allocation10], 4294966784 }
  0x49   :  { %543 = dma.done.wait [#allocation13], 256  }
  0x4a   :  { %544 = vsyncadd [#allocation13], 4294967040  ;;  %vm78_vm0 = vcmask 1024   ;;  %v555_v0 = vmov 0.0|0.0   ;;  %v556_v1 = vmov -inf   ;;  %v557_v2 = vmov 0.0  }
  0x4b   :  { %378 = vmatprep.subr.bf16.mxu0 %v555_v0  ;;  %79 = vst.msk [vmem:[#allocation3] sm:$0x3] %vm78_vm0, %v556_v1  ;;  %80 = vst.msk [vmem:[#allocation4] sm:$0x3] %vm78_vm0, %v557_v2  ;;  %vm81_vm1 = vcmask 254976   ;;  %vm558_vm2 = vmmov 0   ;;  %v168_v9 = vlaneseq }
  0x4c   :  { %82 = vst.msk [vmem:[#allocation5] sm:$0x3] %vm81_vm1, %v557_v2  ;;  %375 = vmatprep.mubr.msk.f32.mxu0 %vm558_vm2, %v557_v2  ;;  %v84_v3 = vld [vmem:[#allocation12] sm:$0xff]  ;;  %v85_v4 = vld [vmem:[#allocation12 + $0x8] sm:$0xff]  ;;  %v83_v6 = vld [vmem:[#allocation6] sm:$0x3] }
  0x4d   :  { %v379_v5 = vpack.c.bf16 %v85_v4, %v84_v3  ;;  %vm86_vm3 = vcmask 130048   ;;  %v559_v7 = vmov 1966171168   ;;  %v169_v11 = vshrl.u32 %v168_v9, 7  ;;  %v160_v19 = vld [vmem:[#allocation9] sm:$0xff]  ;;  %v161_v22 = vld [vmem:[#allocation9 + $0x8] sm:$0xff] }
  0x4e   :  { %v166_v8 = vunpack.c.l.s4 %v559_v7  ;;  %vm199_vm4 = vcmask 261120   ;;  %v209_v28 = vand.u32 127, %v168_v9  ;;  %vm218_vm5 = vcmask 1041409   ;;  %v162_v54 = vld [vmem:[#allocation11] sm:$0xff]  ;;  %v163_v55 = vld [vmem:[#allocation11 + $0x8] sm:$0xff]  ;;  %s561_s3 = smov [#allocation14]  }
  0x4f   :  { %380 = vmatpush3.bf16.msra.mxu0 %v379_v5  ;;  %v189_v16 = vsub.s32 0, %v169_v11  ;;  %vm221_vm6 = vcmask 58368   ;;  %v560_v36 = vmov 0   ;;  %v241_v41 = vsub.s32 1, %v169_v11  ;;  %s342_s28 = sshll.u32 %s561_s3, 4  ;;  %s562_s29 = smov [#allocation15]   ;;  %s343_s28 = int_to_ptr.vmem [resolvable:$true] %s342_s28 }
  0x50   :  { %v167_v10 = vunpack.c.0.s8 %v166_v8  ;;  %v212_v30 = vsub.s32 %v209_v28, %v169_v11  ;;  %395 = vset.pattern.permute.xlu1 %v560_v36  ;;  %396 = vset.pattern.permute.xlu0 %v560_v36  ;;  %s352_s17 = sshll.u32 %s562_s29, 4  ;;  %s495_s1 = scalar_lea.vmem %s343_s28, 32  ;;  %s353_s17 = int_to_ptr.vmem [resolvable:$true] %s352_s17 }
  0x51   :  { %p496_p4 = scmp.ne.s32.totalorder %s343_s28, %s495_s1  ;;  %p500_p5 = scmp.lt.s32.totalorder %s343_s28, %s343_s28 }
  0x52   :  { %376 = vmatmul.mubr.msk.f32.vlgmr.msra.gmra.mrb[0].mxu0 %vm86_vm3, %v83_v6  ;;  %v170_v12 = vsub.s32 %v167_v10, %v169_v11  ;;  %v223_v37 = vld [vmem:[#allocation3] sm:$0x3]  ;;  %p501_p6 = scmp.lt.s32.totalorder %s495_s1, %s495_s1 }
  0x54   :  { %p502_p7 = por %p501_p6, %p500_p5 }
  0x56   :  { %p503_p8 = pnand %p502_p7, %p496_p4 }
 0x125   :  { %v156_v13 = vpop.f32.mrb[0].mxu0 }
 0x126   :  { %v171_v14 = vrot.slane %v156_v13, %v170_v12  ;;  %v377_v15 = vpop.f32.mrb[1].mxu0  ;;  %v277_v13 = vld [vmem:[#allocation5] sm:$0x3] }
 0x128   :  { %v172_v17 = vcombine.high %v171_v14, %v171_v14  ;;  %v179_v18 = vrot.slane %v171_v14, %v170_v12 }
 0x12a   :  { %v186_v20 = vrot.slane %v172_v17, %v170_v12  ;;  %v190_v21 = vrot.slane %v179_v18, %v189_v16 }
 0x12c   :  { %v197_v23 = vmul.f32 %v190_v21, %v160_v19  ;;  %v194_v24 = vrot.slane %v186_v20, %v189_v16  ;;  %v251_v20 = vld [vmem:[#allocation4] sm:$0x3] }
 0x12e   :  { %v200_v25 = vsel %vm199_vm4, %v197_v23, 0.0  ;;  %v198_v26 = vmul.f32 %v194_v24, %v161_v22 }
 0x12f   :  { %201 = vadd.xlane.f32.xlu0 %v200_v25 }
 0x130   :  { %v203_v27 = vsel %vm199_vm4, %v198_v26, 0.0 }
 0x133   :  { %204 = vadd.xlane.f32.xlu0 %v203_v27 }
 0x1bc   :  { %v202_v29 = vpop.xlane.xlu0 %201 }
 0x1bd   :  { %v213_v32 = vrot.slane %v202_v29, %v212_v30 }
 0x1c0   :  { %v205_v31 = vpop.xlane.xlu0 %204 }
 0x1c1   :  { %v217_v33 = vrot.slane %v205_v31, %v212_v30 }
 0x1c3   :  { %v219_v34 = vsel %vm218_vm5, %v217_v33, %v213_v32 }
 0x1c4   :  { %v224_v35 = vsel %vm221_vm6, %v219_v34, -inf  ;;  %222 = vst.msk [vmem:[#allocation2] sm:$0x3] %vm221_vm6, %v219_v34 }
 0x1c5   :  { %225 = vmax.xlane.f32.xlu1 %v224_v35 }
 0x1cb   :  { %v324_v26 = vld [vmem:[#allocation2] sm:$0x3] }
 0x252   :  { %v226_v38 = vpop.xlane.xlu1 %225 }
 0x253   :  { %v227_v39 = vmax.f32 %v223_v37, %v226_v38 }
 0x255   :  { %v228_v40 = vsub.f32 %v223_v37, %v227_v39  ;;  %309 = vst.msk [vmem:[#allocation3] sm:$0x3] %vm78_vm0, %v227_v39  ;;  %233 = vperm.xlu1 %395, %v227_v39  }
 0x257   :  { %v229_v49 = vmul.f32 1.442695, %v228_v40 }
 0x25c   :  { %v325_v52 = vld [vmem:[#allocation3] sm:$0x3] }
 0x2d4   :  { %v234_v42 = vpop.permute.xlu1 %233 }
 0x2d5   :  { %v238_v43 = vrot.slane %v234_v42, %v189_v16  ;;  %v242_v44 = vrot.slane %v234_v42, %v241_v41 }
 0x2d7   :  { %v245_v45 = vsub.f32 %v202_v29, %v238_v43  ;;  %v246_v46 = vsub.f32 %v205_v31, %v242_v44 }
 0x2d9   :  { %v247_v47 = vmul.f32 1.442695, %v245_v45  ;;  %v249_v48 = vmul.f32 1.442695, %v246_v46 }
 0x2db   :  { %397 = vpow2.f32 %v247_v47 }
 0x2dc   :  { %399 = vpow2.f32 %v249_v48 }
 0x2dd   :  { %401 = vpow2.f32 %v229_v49 }
 0x2e5   :  { %v398_v50 = vpop.eup %397 }
 0x2e6   :  { %v400_v51 = vpop.eup %399  ;;  %256 = vperm.xlu0 %396, %v398_v50  }
 0x2e7   :  { %259 = vperm.xlu1 %395, %v400_v51   ;;  %v402_v53 = vpop.eup %401 }
 0x2e8   :  { %v252_v21 = vmul.f32 %v402_v53, %v251_v20 }
 0x2ea   :  { %328 = vperm.xlu0 %396, %v325_v52  }
 0x2ee   :  { %280 = vperm.xlu0 %396, %v402_v53  }
 0x365   :  { %v257_v56 = vpop.permute.xlu0 %256 }
 0x366   :  { %v260_v57 = vpop.permute.xlu1 %259  ;;  %v264_v58 = vrot.slane %v257_v56, %v212_v30  ;;  %v286_v59 = vmul.f32 %v257_v56, %v162_v54 }
 0x367   :  { %v268_v60 = vrot.slane %v260_v57, %v212_v30  ;;  %v287_v61 = vmul.f32 %v260_v57, %v163_v55 }
 0x368   :  { %v288_v62 = vsel %vm199_vm4, %v286_v59, 0.0 }
 0x369   :  { %v295_v63 = vsel %vm199_vm4, %v287_v61, 0.0  ;;  %v289_v0 = vrot.slane %v288_v62, 4  ;;  %v269_v1 = vsel %vm218_vm5, %v268_v60, %v264_v58  ;;  %v329_v6 = vpop.permute.xlu0 %328 }
 0x36a   :  { %v296_v2 = vrot.slane %v295_v63, 4  ;;  %v271_v3 = vsel %vm221_vm6, %v269_v1, 0.0  ;;  %v331_v27 = vsub.f32 %v324_v26, %v329_v6 }
 0x36b   :  { %v290_v4 = vadd.f32 %v289_v0, %v288_v62  ;;  %272 = vadd.xlane.f32.xlu1 %v271_v3 }
 0x36c   :  { %v297_v5 = vadd.f32 %v296_v2, %v295_v63  ;;  %v332_v28 = vmul.f32 1.442695, %v331_v27 }
 0x36d   :  { %v291_v7 = vrot.slane %v290_v4, 2  ;;  %v281_v14 = vpop.permute.xlu0 %280 }
 0x36e   :  { %v298_v8 = vrot.slane %v297_v5, 2  ;;  %v283_v17 = vmul.f32 %v281_v14, %v277_v13 }
 0x36f   :  { %v292_v9 = vadd.f32 %v291_v7, %v290_v4 }
 0x370   :  { %v299_v10 = vadd.f32 %v298_v8, %v297_v5 }
 0x371   :  { %v293_v11 = vrot.slane %v292_v9, 1 }
 0x372   :  { %v300_v12 = vrot.slane %v299_v10, 1 }
 0x373   :  { %v294_v15 = vadd.f32 %v293_v11, %v292_v9 }
 0x374   :  { %v301_v16 = vadd.f32 %v300_v12, %v299_v10 }
 0x376   :  { %v304_v18 = vsel %vm218_vm5, %v301_v16, %v294_v15 }
 0x377   :  { %v306_v19 = vadd.f32 %v304_v18, %v283_v17 }
 0x379   :  { %308 = vst.msk [vmem:[#allocation5] sm:$0x3] %vm81_vm1, %v306_v19 }
 0x380   :  { %v316_v30 = vld [vmem:[#allocation5] sm:$0x3] }
 0x3f8   :  { %v273_v22 = vpop.xlane.xlu1 %272 }
 0x3f9   :  { %v274_v23 = vadd.f32 %v273_v22, %v252_v21 }
 0x3fb   :  { %276 = vst.msk [vmem:[#allocation4] sm:$0x3] %vm78_vm0, %v274_v23 }
 0x402   :  { %v313_v24 = vld [vmem:[#allocation4] sm:$0x3] }
 0x403   :  { %403 = vrcp.f32 %v313_v24 }
 0x404   :  { %405 = vpow2.f32 %v332_v28 }
 0x40d   :  { %v404_v25 = vpop.eup %403 }
 0x40e   :  { %319 = vperm.xlu0 %396, %v404_v25   ;;  %v406_v29 = vpop.eup %405 }
 0x48d   :  { %v320_v31 = vpop.permute.xlu0 %319 }
 0x48e   :  { %v322_v32 = vmul.f32 %v320_v31, %v316_v30  ;;  %v334_v33 = vmul.f32 %v406_v29, %v320_v31 }
 0x490   :  { %323 = vst.msk [vmem:[#allocation14] sm:$0x3] %vm81_vm1, %v322_v32 }
 0x491   :  { %335 = vst.msk [vmem:[#allocation15] sm:$0x3] %vm221_vm6, %v334_v33 }
 0x492   :  { %506 = shalt.err (!%p503_p8)
}
 0x493   :  { %s507_s20 = scalar_lea.hbm %s696_s4, 32 }
 0x494   :  { %p508_p9 = scmp.ne.s32.totalorder %s696_s4, %s507_s20  ;;  %p511_p10 = scmp.lt.u32.totalorder %s507_s20, %s696_s4 }
 0x496   :  { %p513_p11 = pnand %p511_p10, %p508_p9 }
 0x498   :  { %516 = shalt.err (!%p513_p11)
}
 0x499   :  { %345 = dma.vmem_to_hbm [thread:$0]  %s343_s28, 32, %s696_s4, [#allocation8]  }
 0x49a   :  { %s517_s27 = scalar_lea.vmem %s353_s17, 32  ;;  %p522_p13 = scmp.lt.s32.totalorder %s353_s17, %s353_s17 }
 0x49b   :  { %p518_p12 = scmp.ne.s32.totalorder %s353_s17, %s517_s27  ;;  %p523_p0 = scmp.lt.s32.totalorder %s517_s27, %s517_s27 }
 0x49d   :  { %p524_p1 = por %p523_p0, %p522_p13 }
 0x49f   :  { %p525_p2 = pnand %p524_p1, %p518_p12 }
 0x4a1   :  { %528 = shalt.err (!%p525_p2)
}
 0x4a2   :  { %s529_s6 = scalar_lea.hbm %s697_s5, 32 }
 0x4a3   :  { %p530_p3 = scmp.ne.s32.totalorder %s697_s5, %s529_s6  ;;  %p533_p4 = scmp.lt.u32.totalorder %s529_s6, %s697_s5 }
 0x4a5   :  { %p535_p5 = pnand %p533_p4, %p530_p3 }
 0x4a7   :  { %538 = shalt.err (!%p535_p5)
}
 0x4a8   :  { %355 = dma.vmem_to_hbm [thread:$0]  %s353_s17, 32, %s697_s5, [#allocation16]  }
 0x4a9   :  { %545 = dma.done.wait [#allocation8], 32  }
 0x4aa   :  { %546 = vsyncadd [#allocation8], 4294967264 }
 0x4ab   :  { %547 = dma.done.wait [#allocation16], 32  }
 0x4ac   :  { %548 = vsyncadd [#allocation16], 4294967264 }
 0x4ad   :  { %362 = vsyncpa [#allocation7], 1 }
 0x4ae   :  { %363 = vsyncpa [#allocation10], 1 }
 0x4af   :  { %364 = vsyncpa [#allocation13], 1 }
 0x4b0   :  { %365 = vsyncpa [#allocation8], 1 }
 0x4b1   :  { %366 = vsyncpa [#allocation16], 1 }

</bundles_post_ra>
